<compile_context>
chip_gen: v5e
topology: v5e:2x2
jax: 0.10.0
libtpu: 0.0.40
codegen_flags: <defaults>
</compile_context>

<pallas_src>
import functools

import jax
import jax.numpy as jnp
from jax.experimental import pallas as pl
from jax.experimental.pallas import tpu as pltpu


def _make_kernel(nux_node, embed_dim):
    def kernel(*args):
        # args = (e_0, ..., e_{nux_node-1}, w_ref, b_ref, o_ref)
        embed_refs = args[:nux_node]
        w_ref = args[nux_node]
        b_ref = args[nux_node + 1]
        o_ref = args[nux_node + 2]

        # Fused "concat + Linear": K-sliced matmuls accumulated in f32.
        acc = jnp.dot(
            embed_refs[0][...],
            w_ref[pl.ds(0, embed_dim), :],
            preferred_element_type=jnp.float32,
        )
        for i in range(1, nux_node):
            acc = acc + jnp.dot(
                embed_refs[i][...],
                w_ref[pl.ds(i * embed_dim, embed_dim), :],
                preferred_element_type=jnp.float32,
            )

        # Bias + ReLU (f32).
        y = acc + b_ref[...].astype(jnp.float32)
        y = jnp.maximum(y, 0.0)

        # L2 row-normalize via rsqrt (EUP).  Matches F.normalize eps semantics:
        # rsqrt(max(sumsq, eps^2)) == 1 / max(norm, eps) with eps = 1e-12.
        sumsq = jnp.sum(y * y, axis=-1, keepdims=True)
        inv = jax.lax.rsqrt(jnp.maximum(sumsq, 1e-24))
        y = y * inv

        o_ref[...] = y.astype(o_ref.dtype)

    return kernel


def mag_content_agg(embed_list, weight, bias, *, tm=512):
    """embed_list: list of (N, embed_dim) arrays; weight: (D_in, D_out); bias: (D_out,)."""
    nux_node = len(embed_list)
    n, embed_dim = embed_list[0].shape
    d_in = embed_dim * nux_node
    d_out = weight.shape[1]
    assert weight.shape[0] == d_in

    # Row-tile size: multiple of 8, capped (VMEM-friendly on v5e/v6e/v7x).
    # For D_in=128 f32 a 512-row tile is ~256 KiB per input buffer -> tiny vs.
    # even the v7x 32 MiB scoped default, so no vmem_limit_bytes override needed.
    tm = min(tm, max(8, ((n + 7) // 8) * 8))
    tm = (tm // 8) * 8

    b2d = bias.reshape(1, d_out)
    grid = (pl.cdiv(n, tm),)

    embed_specs = [
        pl.BlockSpec((tm, embed_dim), lambda i: (i, 0)) for _ in range(nux_node)
    ]
    in_specs = embed_specs + [
        pl.BlockSpec((d_in, d_out), lambda i: (0, 0)),   # weight: VMEM-resident
        pl.BlockSpec((1, d_out), lambda i: (0, 0)),      # bias: VMEM-resident
    ]
    out_spec = pl.BlockSpec((tm, d_out), lambda i: (i, 0))

    cost = pl.CostEstimate(
        flops=2 * n * d_in * d_out,
        transcendentals=n,  # one rsqrt per row
        bytes_accessed=4 * (n * d_in + d_in * d_out + d_out + n * d_out),
    )

    out = pl.pallas_call(
        _make_kernel(nux_node, embed_dim),
        out_shape=jax.ShapeDtypeStruct((n, d_out), embed_list[0].dtype),
        grid=grid,
        in_specs=in_specs,
        out_specs=out_spec,
        compiler_params=pltpu.CompilerParams(
            dimension_semantics=("parallel",),  # shard row tiles across TCs (v7x)
        ),
        cost_estimate=cost,
    )(*embed_list, weight, b2d)
    return out


def reference(embed_list, weight, bias):
    x = jnp.concatenate(embed_list, axis=-1)
    y = jnp.maximum(x @ weight + bias, 0.0)
    norm = jnp.sqrt(jnp.sum(y * y, axis=-1, keepdims=True))
    return y / jnp.maximum(norm, 1e-12)


if __name__ == "__main__":
    # Small, module-consistent shapes.
    embed_dim = 32
    nux_node = 4
    d_in = embed_dim * nux_node  # 128

    key = jax.random.PRNGKey(0)
    k_emb, k_w, k_b, k_emb2 = jax.random.split(key, 4)

    # Deterministic Linear params (PyTorch-style uniform(-1/sqrt(fan_in), ...)),
    # stored as (in_features, out_features).
    bound = 1.0 / jnp.sqrt(jnp.float32(d_in))
    weight = jax.random.uniform(k_w, (d_in, embed_dim), jnp.float32, -bound, bound)
    bias = jax.random.uniform(k_b, (embed_dim,), jnp.float32, -bound, bound)

    # Case 1: tiny batch (single tile).
    batch = 8
    embeds = jax.random.normal(k_emb, (nux_node, batch, embed_dim), dtype=jnp.float32)
    embed_list = [embeds[i] for i in range(nux_node)]

    out = mag_content_agg(embed_list, weight, bias)
    out = jax.block_until_ready(out)
    ref = reference(embed_list, weight, bias)
    assert out.shape == (batch, embed_dim)
    assert jnp.allclose(out, ref, atol=1e-5, rtol=1e-5)

    # Case 2: multi-tile grid with a padded tail tile (exercises row tiling).
    batch2 = 200
    embeds2 = jax.random.normal(
        k_emb2, (nux_node, batch2, embed_dim), dtype=jnp.float32
    )
    embed_list2 = [embeds2[i] for i in range(nux_node)]

    out2 = mag_content_agg(embed_list2, weight, bias, tm=64)
    out2 = jax.block_until_ready(out2)
    ref2 = reference(embed_list2, weight, bias)
    assert out2.shape == (batch2, embed_dim)
    assert jnp.allclose(out2, ref2, atol=1e-5, rtol=1e-5)

    # TODO(synk): for production, feed bf16 embeddings/weight (keep f32 accum +
    # epilogue) and fuse multiple 32-wide heads into one lane-dense output if
    # the surrounding model has them; not done here to keep the f32 reference
    # comparison exact.

    print("KERNEL_OK")
</pallas_src>

<mosaic_0001>
module attributes {stable_mosaic.version = 11 : i64} {
  func.func @kernel(%arg0: i32, %arg1: memref<8x32xf32, #tpu.memory_space<vmem>>, %arg2: memref<8x32xf32, #tpu.memory_space<vmem>>, %arg3: memref<8x32xf32, #tpu.memory_space<vmem>>, %arg4: memref<8x32xf32, #tpu.memory_space<vmem>>, %arg5: memref<128x32xf32, #tpu.memory_space<vmem>>, %arg6: memref<1x32xf32, #tpu.memory_space<vmem>>, %arg7: memref<8x32xf32, #tpu.memory_space<vmem>>) attributes {dimension_semantics = [#tpu.dimension_semantics<parallel>], iteration_bounds = array<i64: 1>, scalar_prefetch = 0 : i64, scratch_operands = 0 : i64, tpu.core_type = #tpu.core_type<tc>, window_params = [{transform_indices = @transform_0, window_bounds = array<i64: 8, 32>}, {transform_indices = @transform_1, window_bounds = array<i64: 8, 32>}, {transform_indices = @transform_2, window_bounds = array<i64: 8, 32>}, {transform_indices = @transform_3, window_bounds = array<i64: 8, 32>}, {pipeline_mode = #tpu.pipeline_mode<synchronous>, transform_indices = @transform_4, window_bounds = array<i64: 128, 32>}, {pipeline_mode = #tpu.pipeline_mode<synchronous>, transform_indices = @transform_5, window_bounds = array<i64: 1, 32>}, {transform_indices = @transform_6, window_bounds = array<i64: 8, 32>}]} {
    %c0 = arith.constant 0 : index
    %c0_0 = arith.constant 0 : index
    %0 = vector.load %arg1[%c0, %c0_0] : memref<8x32xf32, #tpu.memory_space<vmem>>, vector<8x32xf32>
    %c0_1 = arith.constant 0 : index
    %c0_2 = arith.constant 0 : index
    %1 = vector.load %arg5[%c0_1, %c0_2] : memref<128x32xf32, #tpu.memory_space<vmem>>, vector<32x32xf32>
    %cst = arith.constant dense<0.000000e+00> : vector<8x32xf32>
    %2 = tpu.matmul %0, %1, %cst {dimension_numbers = #tpu.dot_dimension_numbers<[1], [0], [0], [1], [0, 0, 1, 1], [], []>} : vector<8x32xf32>, vector<32x32xf32>, vector<8x32xf32> -> vector<8x32xf32>
    %c0_3 = arith.constant 0 : index
    %c0_4 = arith.constant 0 : index
    %3 = vector.load %arg2[%c0_3, %c0_4] : memref<8x32xf32, #tpu.memory_space<vmem>>, vector<8x32xf32>
    %c32 = arith.constant 32 : index
    %c0_5 = arith.constant 0 : index
    %4 = vector.load %arg5[%c32, %c0_5] : memref<128x32xf32, #tpu.memory_space<vmem>>, vector<32x32xf32>
    %cst_6 = arith.constant dense<0.000000e+00> : vector<8x32xf32>
    %5 = tpu.matmul %3, %4, %cst_6 {dimension_numbers = #tpu.dot_dimension_numbers<[1], [0], [0], [1], [0, 0, 1, 1], [], []>} : vector<8x32xf32>, vector<32x32xf32>, vector<8x32xf32> -> vector<8x32xf32>
    %6 = arith.addf %2, %5 : vector<8x32xf32>
    %c0_7 = arith.constant 0 : index
    %c0_8 = arith.constant 0 : index
    %7 = vector.load %arg3[%c0_7, %c0_8] : memref<8x32xf32, #tpu.memory_space<vmem>>, vector<8x32xf32>
    %c64 = arith.constant 64 : index
    %c0_9 = arith.constant 0 : index
    %8 = vector.load %arg5[%c64, %c0_9] : memref<128x32xf32, #tpu.memory_space<vmem>>, vector<32x32xf32>
    %cst_10 = arith.constant dense<0.000000e+00> : vector<8x32xf32>
    %9 = tpu.matmul %7, %8, %cst_10 {dimension_numbers = #tpu.dot_dimension_numbers<[1], [0], [0], [1], [0, 0, 1, 1], [], []>} : vector<8x32xf32>, vector<32x32xf32>, vector<8x32xf32> -> vector<8x32xf32>
    %10 = arith.addf %6, %9 : vector<8x32xf32>
    %c0_11 = arith.constant 0 : index
    %c0_12 = arith.constant 0 : index
    %11 = vector.load %arg4[%c0_11, %c0_12] : memref<8x32xf32, #tpu.memory_space<vmem>>, vector<8x32xf32>
    %c96 = arith.constant 96 : index
    %c0_13 = arith.constant 0 : index
    %12 = vector.load %arg5[%c96, %c0_13] : memref<128x32xf32, #tpu.memory_space<vmem>>, vector<32x32xf32>
    %cst_14 = arith.constant dense<0.000000e+00> : vector<8x32xf32>
    %13 = tpu.matmul %11, %12, %cst_14 {dimension_numbers = #tpu.dot_dimension_numbers<[1], [0], [0], [1], [0, 0, 1, 1], [], []>} : vector<8x32xf32>, vector<32x32xf32>, vector<8x32xf32> -> vector<8x32xf32>
    %14 = arith.addf %10, %13 : vector<8x32xf32>
    %c0_15 = arith.constant 0 : index
    %c0_16 = arith.constant 0 : index
    %15 = vector.load %arg6[%c0_15, %c0_16] : memref<1x32xf32, #tpu.memory_space<vmem>>, vector<1x32xf32>
    %16 = vector.broadcast %15 : vector<1x32xf32> to vector<8x32xf32>
    %17 = arith.addf %14, %16 : vector<8x32xf32>
    %cst_17 = arith.constant 0.000000e+00 : f32
    %18 = vector.broadcast %cst_17 : f32 to vector<8x32xf32>
    %19 = arith.maximumf %17, %18 : vector<8x32xf32>
    %20 = arith.mulf %19, %19 : vector<8x32xf32>
    %cst_18 = arith.constant dense<0.000000e+00> : vector<8xf32>
    %21 = vector.multi_reduction <add>, %20, %cst_18 [1] : vector<8x32xf32> to vector<8xf32>
    %22 = vector.shape_cast %21 : vector<8xf32> to vector<8x1xf32>
    %cst_19 = arith.constant 1.000000e-24 : f32
    %23 = vector.broadcast %cst_19 : f32 to vector<8x1xf32>
    %24 = arith.maximumf %22, %23 : vector<8x1xf32>
    %25 = math.rsqrt %24 : vector<8x1xf32>
    %26 = vector.broadcast %25 : vector<8x1xf32> to vector<8x32xf32>
    %27 = arith.mulf %19, %26 : vector<8x32xf32>
    %c0_20 = arith.constant 0 : index
    %c0_21 = arith.constant 0 : index
    %28 = vector.load %arg7[%c0_20, %c0_21] : memref<8x32xf32, #tpu.memory_space<vmem>>, vector<8x32xf32>
    tpu.vector_store %arg7[%c0_20, %c0_21], %27 {strides = array<i32>} : memref<8x32xf32, #tpu.memory_space<vmem>>, vector<8x32xf32>,
    return
  }
  func.func @transform_0(%arg0: i32) -> (i32, i32) {
    %c0_i32 = arith.constant 0 : i32
    %c0_i32_0 = arith.constant 0 : i32
    return %arg0, %c0_i32 : i32, i32
  }
  func.func @transform_1(%arg0: i32) -> (i32, i32) {
    %c0_i32 = arith.constant 0 : i32
    %c0_i32_0 = arith.constant 0 : i32
    return %arg0, %c0_i32 : i32, i32
  }
  func.func @transform_2(%arg0: i32) -> (i32, i32) {
    %c0_i32 = arith.constant 0 : i32
    %c0_i32_0 = arith.constant 0 : i32
    return %arg0, %c0_i32 : i32, i32
  }
  func.func @transform_3(%arg0: i32) -> (i32, i32) {
    %c0_i32 = arith.constant 0 : i32
    %c0_i32_0 = arith.constant 0 : i32
    return %arg0, %c0_i32 : i32, i32
  }
  func.func @transform_4(%arg0: i32) -> (i32, i32) {
    %c0_i32 = arith.constant 0 : i32
    %c0_i32_0 = arith.constant 0 : i32
    %c0_i32_1 = arith.constant 0 : i32
    return %c0_i32, %c0_i32_0 : i32, i32
  }
  func.func @transform_5(%arg0: i32) -> (i32, i32) {
    %c0_i32 = arith.constant 0 : i32
    %c0_i32_0 = arith.constant 0 : i32
    %c0_i32_1 = arith.constant 0 : i32
    return %c0_i32, %c0_i32_0 : i32, i32
  }
  func.func @transform_6(%arg0: i32) -> (i32, i32) {
    %c0_i32 = arith.constant 0 : i32
    %c0_i32_0 = arith.constant 0 : i32
    return %arg0, %c0_i32 : i32, i32
  }
}

</mosaic_0001>

<bundles_post_ra>
// kernel: tpu_custom_call.1
= control target key start
LH: loop header
LB: loop body
LE: loop exit
PB: predicated region body
PF: predicated region fallthrough
CT: control target
= control target key end

     0   :  { %vm34_vm0 = vcmask 261120   ;;  %s320_s0 = inlined_call_operand.vmem [shape: f32[8,32], index: 0, kind: input, shape index: {}]   ;;  %s321_s1 = inlined_call_operand.vmem [shape: f32[8,32], index: 1, kind: input, shape index: {}]   ;;  %s322_s2 = inlined_call_operand.vmem [shape: f32[8,32], index: 2, kind: input, shape index: {}]   ;;  %s323_s3 = inlined_call_operand.vmem [shape: f32[8,32], index: 3, kind: input, shape index: {}]   ;;  %s324_s4 = inlined_call_operand.vmem [shape: f32[128,32], index: 4, kind: input, shape index: {}]   ;;  %s325_s5 = inlined_call_operand.vmem [shape: f32[1,32], index: 5, kind: input, shape index: {}]   ;;  %s326_s6 = inlined_call_operand.hbm [shape: f32[8,32], index: 6, kind: output, shape index: {}]  }
   0x1   :  { %v85_v0 = vld [vmem:[%s324_s4 + $0x58] sm:$0xff]  ;;  %v84_v1 = vld [vmem:[%s324_s4 + $0x50] sm:$0xff]  ;;  %v83_v5 = vld [vmem:[%s324_s4 + $0x48] sm:$0xff] }
   0x2   :  { %v114_v2 = vld [vmem:[%s324_s4 + $0x78] sm:$0xff]  ;;  %101 = vmatpush.msra.mxu2 %v85_v0  ;;  %v113_v6 = vld [vmem:[%s324_s4 + $0x70] sm:$0xff]  ;;  %v82_v9 = vld [vmem:[%s324_s4 + $0x40] sm:$0xff] }
   0x3   :  { %130 = vmatpush.msra.mxu3 %v114_v2  ;;  %v33_v3 = vld [vmem:[%s324_s4 + $0x38] sm:$0xff]  ;;  %v32_v7 = vld [vmem:[%s324_s4 + $0x30] sm:$0xff]  ;;  %v112_v10 = vld [vmem:[%s324_s4 + $0x68] sm:$0xff] }
   0x4   :  { %v28_v4 = vld [vmem:[%s324_s4 + $0x18] sm:$0xff]  ;;  %50 = vmatpush.msra.mxu0 %v33_v3  ;;  %v27_v8 = vld [vmem:[%s324_s4 + $0x10] sm:$0xff]  ;;  %102 = vmatpush.msra.mxu2 %v84_v1  ;;  %v31_v11 = vld [vmem:[%s324_s4 + $0x28] sm:$0xff] }
   0x5   :  { %73 = vmatpush.msra.mxu1 %v28_v4  ;;  %131 = vmatpush.msra.mxu3 %v113_v6  ;;  %v26_v12 = vld [vmem:[%s324_s4 + $0x8] sm:$0xff]  ;;  %v111_v13 = vld [vmem:[%s324_s4 + $0x60] sm:$0xff] }
   0x6   :  { %51 = vmatpush.msra.mxu0 %v32_v7  ;;  %103 = vmatpush.msra.mxu2 %v83_v5  ;;  %v81_v14 = vld [vmem:[%s322_s2] sm:$0xff] }
   0x7   :  { %74 = vmatpush.msra.mxu1 %v27_v8  ;;  %132 = vmatpush.msra.mxu3 %v112_v10  ;;  %v110_v15 = vld [vmem:[%s323_s3] sm:$0xff] }
   0x8   :  { %52 = vmatpush.msra.mxu0 %v31_v11  ;;  %v30_v16 = vld [vmem:[%s324_s4 + $0x20] sm:$0xff]  ;;  %104 = vmatpush.msra.mxu2 %v82_v9 }
   0x9   :  { %75 = vmatpush.msra.mxu1 %v26_v12  ;;  %v25_v17 = vld [vmem:[%s324_s4] sm:$0xff]  ;;  %133 = vmatpush.msra.mxu3 %v111_v13 }
   0xa   :  { %v29_v18 = vld [vmem:[%s321_s1] sm:$0xff] }
   0xb   :  { %v24_v19 = vld [vmem:[%s320_s0] sm:$0xff] }
   0xc   :  { %11 = vsyncpa [#allocation3], 0  ;;  %180 = vmatmul.msk.f32.vlgmr.msra.gmra.mxu2 %vm34_vm0, %v81_v14  ;;  %181 = vmatmul.msk.f32.vlgmr.msra.gmra.mxu3 %vm34_vm0, %v110_v15  ;;  %v183_v26 = vld [vmem:[%s325_s5] ss:$0 sm:$0xff]  ;;  %s212_s0 = smov [#allocation2]   ;;  %s169_s13 = sshll.u32 %s326_s6, 4  ;;  %s170_s13 = int_to_ptr.hbm [resolvable:$true] %s169_s13 }
   0xd   :  { %53 = vmatpush.msra.mxu0 %v30_v16  ;;  %76 = vmatpush.msra.mxu1 %v25_v17  ;;  %s167_s4 = sshll.u32 %s212_s0, 4  ;;  %s168_s4 = int_to_ptr.vmem [resolvable:$true] %s167_s4 }
   0xe   :  { %178 = vmatmul.msk.f32.vlgmr.msra.gmra.mxu0 %vm34_vm0, %v29_v18  ;;  %179 = vmatmul.msk.f32.vlgmr.msra.gmra.mxu1 %vm34_vm0, %v24_v19 }
  0x8b   :  { %v55_v20 = vpop.f32.mrf.mxu0  ;;  %v78_v21 = vpop.f32.mrf.mxu1 }
  0x8c   :  { %v79_v22 = vadd.f32 %v78_v21, %v55_v20 }
  0x8f   :  { %v106_v23 = vpop.f32.mrf.mxu2  ;;  %v135_v24 = vpop.f32.mrf.mxu3 }
  0x90   :  { %v109_v25 = vadd.f32 %v106_v23, %v79_v22 }
  0x92   :  { %v138_v27 = vadd.f32 %v135_v24, %v109_v25 }
  0x94   :  { %v143_v28 = vadd.f32 %v183_v26, %v138_v27 }
  0x96   :  { %v144_v29 = vmax.f32 %v143_v28, 0.0 }
  0x98   :  { %v145_v30 = vmul.f32 %v144_v29, %v144_v29 }
  0x9a   :  { %v146_v31 = vsel %vm34_vm0, %v145_v30, 0.0 }
  0x9b   :  { %147 = vadd.xlane.f32.xlu0 %v146_v31 }
 0x10e   :  { %v148_v32 = vpop.xlane.xlu0 %147 }
 0x10f   :  { %v149_v33 = vmax.f32 %v148_v32, 1e-24 }
 0x111   :  { %184 = vrsqrt.f32 %v149_v33  ;;  %vm156_vm2 = vweird.f32 %v149_v33 }
 0x117   :  { %v185_v34 = vpop.eup %184 }
 0x118   :  { %v151_v35 = vmul.f32 %v185_v34, %v149_v33  ;;  %vm157_vm1 = vweird.f32 %v185_v34 }
 0x119   :  { %vm158_vm3 = vmor %vm156_vm2, %vm157_vm1 }
 0x11a   :  { %v152_v36 = vmul.f32 %v185_v34, %v151_v35 }
 0x11c   :  { %v153_v37 = vmul.f32 0.5, %v152_v36 }
 0x11e   :  { %v154_v38 = vsub.f32 1.5, %v153_v37 }
 0x120   :  { %v155_v39 = vmul.f32 %v185_v34, %v154_v38 }
 0x122   :  { %v159_v40 = vsel %vm158_vm3, %v185_v34, %v155_v39 }
 0x123   :  { %v160_v41 = vmul.f32 %v159_v40, %v144_v29 }
 0x125   :  { %161 = vst.msk [vmem:[#allocation2] sm:$0xff] %vm34_vm0, %v160_v41 }
 0x126   :  { %172 = dma.vmem_to_hbm [thread:$0]  %s168_s4, 128, %s170_s13, [#allocation3]  }
 0x127   :  { %210 = dma.done.wait [#allocation3], 128  }
 0x128   :  { %211 = vsyncadd [#allocation3], 4294967168 }
 0x129   :  { %177 = vsyncpa [#allocation3], 1 }

</bundles_post_ra>
